<compile_context>
chip_gen: v7x
topology: tpu7x:2x2x1
jax: 0.10.0
libtpu: 0.0.40
codegen_flags: <defaults>
</compile_context>

<pallas_src>
import functools
import math

import jax
import jax.numpy as jnp
from jax.experimental import pallas as pl
from jax.experimental.pallas import tpu as pltpu

_TARGET_TILE_ROWS = 512   # 512 x 1024 x 4B = 2 MiB per f32 block buffer


def _smooth_label_ce_kernel(preds_ref, targets_ref, out_ref, *,
                            n, smooth, gamma, epsilon):
    # Elementwise on the whole VMEM tile: VPU (mul/min/max) + EUP (log).
    p = preds_ref[...].astype(jnp.float32)
    t = targets_ref[...].astype(jnp.float32)

    # clip_by_tensor(preds, eps, 1 - eps): single min + single max (propagates
    # NaN the same way torch's compare-based clamp does).
    p = jnp.maximum(jnp.minimum(p, jnp.float32(1.0 - epsilon)),
                    jnp.float32(epsilon))

    log_p = jnp.log(p)
    if gamma != 0:
        if float(gamma).is_integer() and gamma > 0:
            # Integer power via repeated VPU multiplies; avoids the
            # exp(gamma*log(1-p)) pair on the single-port EUP.
            q = 1.0 - p
            w = q
            for _ in range(int(gamma) - 1):
                w = w * q
            log_p = log_p * w
        else:
            log_p = log_p * (1.0 - p) ** gamma

    neg_log_p = -log_p
    if smooth != 0:
        # Fused:  -log_p/n*smooth + (-log_p*t)*(1-smooth)
        #       = -log_p * (smooth/n + t*(1-smooth))
        out_ref[...] = neg_log_p * (jnp.float32(smooth / n)
                                    + t * jnp.float32(1.0 - smooth))
    else:
        out_ref[...] = neg_log_p * t


def _choose_layout(total):
    """Pick a lane-dense (rows, lanes) view; no element padding when
    total % 128 == 0 (the common case)."""
    for lanes in (1024, 512, 256, 128):
        if total % lanes == 0:
            return lanes, 0
    # Rare fallback: pad the flat array to the next multiple of 1024.
    lanes = 1024
    pad = (-total) % lanes
    return lanes, pad


def _choose_tile_rows(rows):
    """Row-tile size: multiple of 8 (or the full extent when rows < 8),
    capped at _TARGET_TILE_ROWS, and split so the grid is multi-block
    whenever the input is big enough (keeps both v7x TensorCores busy)."""
    if rows <= 8:
        return rows                              # full extent: always legal
    tile = min(_TARGET_TILE_ROWS, (rows // 8) * 8)
    if rows > 16 and pl.cdiv(rows, tile) < 2:
        tile = max(8, (((rows + 1) // 2 + 7) // 8) * 8)
    return tile


def smooth_label_cross_entropy(preds, targets, *, smooth=0.1, gamma=0,
                               epsilon=1e-7):
    """Pallas implementation of SmoothLabelCrossEntropy.forward (elementwise)."""
    assert preds.shape == targets.shape, "preds/targets must have same shape"
    orig_shape = preds.shape
    n = orig_shape[-1]                     # same axis as preds.size()[-1]
    total = math.prod(orig_shape)

    lanes, pad = _choose_layout(total)

    # No dtype upcast in the wrapper: bf16 inputs stay bf16 in HBM; the kernel
    # upcasts in-register.
    p_flat = preds.reshape(-1)
    t_flat = targets.reshape(-1)
    if pad:
        p_flat = jnp.pad(p_flat, (0, pad))
        t_flat = jnp.pad(t_flat, (0, pad))
    rows = (total + pad) // lanes
    p2d = p_flat.reshape(rows, lanes)
    t2d = t_flat.reshape(rows, lanes)

    tile_rows = _choose_tile_rows(rows)
    grid = (pl.cdiv(rows, tile_rows),)     # partial edge block is masked

    kernel = functools.partial(
        _smooth_label_ce_kernel, n=n, smooth=smooth, gamma=gamma,
        epsilon=epsilon)

    elems = rows * lanes
    bytes_accessed = (p2d.size * p2d.dtype.itemsize
                      + t2d.size * t2d.dtype.itemsize
                      + elems * 4)
    cost = pl.CostEstimate(flops=6 * elems,
                           transcendentals=elems,
                           bytes_accessed=bytes_accessed)

    out2d = pl.pallas_call(
        kernel,
        out_shape=jax.ShapeDtypeStruct((rows, lanes), jnp.float32),
        grid=grid,
        in_specs=[
            pl.BlockSpec((tile_rows, lanes), lambda i: (i, 0)),
            pl.BlockSpec((tile_rows, lanes), lambda i: (i, 0)),
        ],
        out_specs=pl.BlockSpec((tile_rows, lanes), lambda i: (i, 0)),
        compiler_params=pltpu.CompilerParams(
            dimension_semantics=("parallel",),
        ),
        cost_estimate=cost,
    )(p2d, t2d)

    out = out2d.reshape(-1)
    if pad:
        out = out[:total]
    return out.reshape(orig_shape)


def _reference(preds, targets, *, smooth=0.1, gamma=0, epsilon=1e-7):
    p = jnp.clip(preds.astype(jnp.float32), epsilon, 1.0 - epsilon)
    n = preds.shape[-1]
    log_p = jnp.log(p)
    if gamma != 0:
        log_p = log_p * (1.0 - p) ** gamma
    loss = -log_p * targets.astype(jnp.float32)
    if smooth != 0:
        loss = -log_p / n * smooth + loss * (1.0 - smooth)
    return loss


def _make_inputs(key, shape):
    k1, k2 = jax.random.split(key)
    logits = jax.random.normal(k1, shape, dtype=jnp.float32)
    preds = jax.nn.softmax(logits, axis=-1)            # probabilities in (0, 1)
    tgt_idx = jax.random.randint(k2, shape[:-1], 0, shape[-1])
    targets = jax.nn.one_hot(tgt_idx, shape[-1], dtype=jnp.float32)
    return preds, targets


if __name__ == "__main__":
    key = jax.random.PRNGKey(0)
    k_a, k_b, k_c, k_d = jax.random.split(key, 4)

    # Small shape consistent with the module (batch=2, channels=4, 16x16):
    # single full-extent block, no padding (2048 % 1024 == 0).
    shape_small = (2, 4, 16, 16)
    preds_s, targets_s = _make_inputs(k_a, shape_small)
    out_s = jax.block_until_ready(smooth_label_cross_entropy(preds_s, targets_s))
    ref_s = _reference(preds_s, targets_s)
    assert out_s.shape == shape_small and out_s.dtype == jnp.float32
    assert jnp.allclose(out_s, ref_s, atol=1e-5, rtol=1e-5)

    # Larger shape: rows=512 -> split into 2 blocks (multi-block grid, no pad).
    shape_big = (2, 4, 256, 256)
    preds_b, targets_b = _make_inputs(k_b, shape_big)
    out_b = jax.block_until_ready(smooth_label_cross_entropy(preds_b, targets_b))
    ref_b = _reference(preds_b, targets_b)
    assert out_b.shape == shape_big and out_b.dtype == jnp.float32
    assert jnp.allclose(out_b, ref_b, atol=1e-5, rtol=1e-5)

    # Odd shape exercising the masked partial edge block (45 rows, tile 40).
    shape_edge = (3, 4, 40, 96)
    preds_e, targets_e = _make_inputs(k_c, shape_edge)
    out_e = jax.block_until_ready(smooth_label_cross_entropy(preds_e, targets_e))
    ref_e = _reference(preds_e, targets_e)
    assert jnp.allclose(out_e, ref_e, atol=1e-5, rtol=1e-5)

    # Shape whose element count is not a multiple of 128 (rare pad fallback).
    shape_pad = (2, 3, 7, 5)
    preds_p, targets_p = _make_inputs(k_d, shape_pad)
    out_p = jax.block_until_ready(smooth_label_cross_entropy(preds_p, targets_p))
    ref_p = _reference(preds_p, targets_p)
    assert jnp.allclose(out_p, ref_p, atol=1e-5, rtol=1e-5)

    # gamma=2 case (integer-power fast path on the VPU).
    out_g = jax.block_until_ready(
        smooth_label_cross_entropy(preds_s, targets_s, gamma=2))
    ref_g = _reference(preds_s, targets_s, gamma=2)
    assert jnp.allclose(out_g, ref_g, atol=1e-5, rtol=1e-5)

    print("KERNEL_OK")
</pallas_src>

<mosaic_0001>
module attributes {stable_mosaic.version = 11 : i64} {
  func.func @_smooth_label_ce_kernel(%arg0: i32, %arg1: memref<2x1024xf32, #tpu.memory_space<vmem>>, %arg2: memref<2x1024xf32, #tpu.memory_space<vmem>>, %arg3: memref<2x1024xf32, #tpu.memory_space<vmem>>) attributes {dimension_semantics = [#tpu.dimension_semantics<parallel>], iteration_bounds = array<i64: 1>, scalar_prefetch = 0 : i64, scratch_operands = 0 : i64, tpu.core_type = #tpu.core_type<tc>, window_params = [{transform_indices = @transform_0, window_bounds = array<i64: 2, 1024>}, {transform_indices = @transform_1, window_bounds = array<i64: 2, 1024>}, {transform_indices = @transform_2, window_bounds = array<i64: 2, 1024>}]} {
    %c0 = arith.constant 0 : index
    %c0_0 = arith.constant 0 : index
    %0 = vector.load %arg1[%c0, %c0_0] : memref<2x1024xf32, #tpu.memory_space<vmem>>, vector<2x1024xf32>
    %c0_1 = arith.constant 0 : index
    %c0_2 = arith.constant 0 : index
    %1 = vector.load %arg2[%c0_1, %c0_2] : memref<2x1024xf32, #tpu.memory_space<vmem>>, vector<2x1024xf32>
    %cst = arith.constant 0.99999988 : f32
    %2 = vector.broadcast %cst : f32 to vector<2x1024xf32>
    %3 = arith.minimumf %0, %2 : vector<2x1024xf32>
    %cst_3 = arith.constant 1.000000e-07 : f32
    %4 = vector.broadcast %cst_3 : f32 to vector<2x1024xf32>
    %5 = arith.maximumf %3, %4 : vector<2x1024xf32>
    %6 = math.log %5 : vector<2x1024xf32>
    %cst_4 = arith.constant 0.000000e+00 : f32
    %7 = vector.broadcast %cst_4 : f32 to vector<2x1024xf32>
    %8 = arith.subf %7, %6 : vector<2x1024xf32>
    %cst_5 = arith.constant 0.899999976 : f32
    %9 = vector.broadcast %cst_5 : f32 to vector<2x1024xf32>
    %10 = arith.mulf %1, %9 : vector<2x1024xf32>
    %cst_6 = arith.constant 6.250000e-03 : f32
    %11 = vector.broadcast %cst_6 : f32 to vector<2x1024xf32>
    %12 = arith.addf %11, %10 : vector<2x1024xf32>
    %13 = arith.mulf %8, %12 : vector<2x1024xf32>
    %c0_7 = arith.constant 0 : index
    %c0_8 = arith.constant 0 : index
    %14 = vector.load %arg3[%c0_7, %c0_8] : memref<2x1024xf32, #tpu.memory_space<vmem>>, vector<2x1024xf32>
    tpu.vector_store %arg3[%c0_7, %c0_8], %13 {strides = array<i32>} : memref<2x1024xf32, #tpu.memory_space<vmem>>, vector<2x1024xf32>,
    return
  }
  func.func @transform_0(%arg0: i32) -> (i32, i32) {
    %c0_i32 = arith.constant 0 : i32
    %c0_i32_0 = arith.constant 0 : i32
    return %arg0, %c0_i32 : i32, i32
  }
  func.func @transform_1(%arg0: i32) -> (i32, i32) {
    %c0_i32 = arith.constant 0 : i32
    %c0_i32_0 = arith.constant 0 : i32
    return %arg0, %c0_i32 : i32, i32
  }
  func.func @transform_2(%arg0: i32) -> (i32, i32) {
    %c0_i32 = arith.constant 0 : i32
    %c0_i32_0 = arith.constant 0 : i32
    return %arg0, %c0_i32 : i32, i32
  }
}

</mosaic_0001>

<bundles_post_ra>
// kernel: tpu_custom_call.1
= control target key start
LH: loop header
LB: loop body
LE: loop exit
PB: predicated region body
PF: predicated region fallthrough
CT: control target
= control target key end

     0   :  { %7 = vsyncpa [#allocation3], 0  ;;  %s207_s0 = inlined_call_operand.hbm [shape: f32[2,1024], index: 0, kind: input, shape index: {}]   ;;  %s208_s1 = inlined_call_operand.hbm [shape: f32[2,1024], index: 1, kind: input, shape index: {}]   ;;  %s209_s2 = inlined_call_operand.hbm [shape: f32[2,1024], index: 2, kind: output, shape index: {}]  }
   0x1   :  { %8 = vsyncpa [#allocation6], 0 }
   0x2   :  { %9 = vsyncpa [#allocation4], 0  ;;  %s153_s9 = smov [#allocation2]   ;;  %s154_s11 = smov [#allocation5]  }
   0x3   :  { %s16_s10 = sshll.u32 %s153_s9, 4  ;;  %s26_s12 = sshll.u32 %s154_s11, 4  ;;  %s17_s10 = int_to_ptr.vmem [resolvable:$true] %s16_s10  ;;  %s27_s12 = int_to_ptr.vmem [resolvable:$true] %s26_s12 }
   0x4   :  { %s81_s15 = scalar_lea.hbm %s207_s0, 256 }
   0x5   :  { %p82_p0 = scmp.ne.s32.totalorder %s207_s0, %s81_s15  ;;  %p85_p1 = scmp.lt.u32.totalorder %s81_s15, %s207_s0 }
   0x7   :  { %p87_p2 = pnand %p85_p1, %p82_p0 }
   0x9   :  { %90 = shalt.err (!%p87_p2)
}
   0xa   :  { %s91_s20 = scalar_lea.vmem %s17_s10, 256  ;;  %p96_p4 = scmp.lt.s32.totalorder %s17_s10, %s17_s10 }
   0xb   :  { %p92_p3 = scmp.ne.s32.totalorder %s17_s10, %s91_s20  ;;  %p97_p5 = scmp.lt.s32.totalorder %s91_s20, %s91_s20 }
   0xd   :  { %p98_p6 = por %p97_p5, %p96_p4 }
   0xf   :  { %p99_p7 = pnand %p98_p6, %p92_p3 }
  0x11   :  { %102 = shalt.err (!%p99_p7)
}
  0x12   :  { %19 = dma.hbm_to_vmem [thread:$0]  %s207_s0, 256, %s17_s10, [#allocation3]  }
  0x13   :  { %s103_s25 = scalar_lea.hbm %s208_s1, 256 }
  0x14   :  { %p104_p8 = scmp.ne.s32.totalorder %s208_s1, %s103_s25  ;;  %p107_p9 = scmp.lt.u32.totalorder %s103_s25, %s208_s1 }
  0x16   :  { %p109_p10 = pnand %p107_p9, %p104_p8 }
  0x18   :  { %112 = shalt.err (!%p109_p10)
}
  0x19   :  { %s113_s30 = scalar_lea.vmem %s27_s12, 256  ;;  %p118_p12 = scmp.lt.s32.totalorder %s27_s12, %s27_s12 }
  0x1a   :  { %p114_p11 = scmp.ne.s32.totalorder %s27_s12, %s113_s30  ;;  %p119_p13 = scmp.lt.s32.totalorder %s113_s30, %s113_s30 }
  0x1c   :  { %p120_p0 = por %p119_p13, %p118_p12 }
  0x1e   :  { %p121_p1 = pnand %p120_p0, %p114_p11 }
  0x20   :  { %124 = shalt.err (!%p121_p1)
}
  0x21   :  { %29 = dma.hbm_to_vmem [thread:$0]  %s208_s1, 256, %s27_s12, [#allocation6]  }
  0x22   :  { %147 = dma.done.wait [#allocation3], 256  }
  0x23   :  { %148 = vsyncadd [#allocation3], 4294967040 }
  0x24   :  { %149 = dma.done.wait [#allocation6], 256  }
  0x25   :  { %150 = vsyncadd [#allocation6], 4294967040  ;;  %v36_v0 = vld [vmem:[#allocation2] sm:$0xff]  ;;  %v37_v1 = vld [vmem:[#allocation2 + $0x8] sm:$0xff]  ;;  %s155_s1 = smov [#allocation7]  }
  0x26   :  { %v40_v2 = vmin.f32 %v36_v0, 0.9999999  ;;  %v41_v3 = vmin.f32 %v37_v1, 0.9999999  ;;  %v38_v6 = vld [vmem:[#allocation5] sm:$0xff]  ;;  %v39_v7 = vld [vmem:[#allocation5 + $0x8] sm:$0xff] }
  0x27   :  { %v50_v8 = vmul.f32 0.9, %v38_v6  ;;  %v51_v9 = vmul.f32 0.9, %v39_v7  ;;  %s64_s4 = sshll.u32 %s155_s1, 4  ;;  %s65_s4 = int_to_ptr.vmem [resolvable:$true] %s64_s4 }
  0x28   :  { %v42_v4 = vmax.f32 %v40_v2, 1e-07  ;;  %v43_v5 = vmax.f32 %v41_v3, 1e-07  ;;  %s125_s5 = scalar_lea.vmem %s65_s4, 256  ;;  %p130_p3 = scmp.lt.s32.totalorder %s65_s4, %s65_s4 }
  0x29   :  { %v52_v13 = vadd.f32 0.00625, %v50_v8  ;;  %v53_v15 = vadd.f32 0.00625, %v51_v9  ;;  %p126_p2 = scmp.ne.s32.totalorder %s65_s4, %s125_s5  ;;  %p131_p4 = scmp.lt.s32.totalorder %s125_s5, %s125_s5 }
  0x2a   :  { %77 = vlog2.f32 %v42_v4 }
  0x2b   :  { %79 = vlog2.f32 %v43_v5  ;;  %p132_p5 = por %p131_p4, %p130_p3 }
  0x2d   :  { %p133_p6 = pnand %p132_p5, %p126_p2 }
  0x34   :  { %v78_v10 = vpop.eup %77 }
  0x35   :  { %v80_v11 = vpop.eup %79  ;;  %v45_v12 = vmul.f32 0.6931472, %v78_v10 }
  0x36   :  { %v47_v14 = vmul.f32 0.6931472, %v80_v11 }
  0x37   :  { %v48_v16 = vsub.f32 0.0, %v45_v12 }
  0x38   :  { %v49_v17 = vsub.f32 0.0, %v47_v14 }
  0x39   :  { %v54_v18 = vmul.f32 %v52_v13, %v48_v16 }
  0x3a   :  { %v55_v19 = vmul.f32 %v53_v15, %v49_v17 }
  0x3b   :  { %56 = vst [vmem:[#allocation7] sm:$0xff] %v54_v18 }
  0x3c   :  { %57 = vst [vmem:[#allocation7 + $0x8] sm:$0xff] %v55_v19 }
  0x3d   :  { %136 = shalt.err (!%p133_p6)
}
  0x3e   :  { %s137_s8 = scalar_lea.hbm %s209_s2, 256 }
  0x3f   :  { %p138_p7 = scmp.ne.s32.totalorder %s209_s2, %s137_s8  ;;  %p141_p8 = scmp.lt.u32.totalorder %s137_s8, %s209_s2 }
  0x41   :  { %p143_p9 = pnand %p141_p8, %p138_p7 }
  0x43   :  { %146 = shalt.err (!%p143_p9)
}
  0x44   :  { %67 = dma.vmem_to_hbm [thread:$0]  %s65_s4, 256, %s209_s2, [#allocation4]  }
  0x45   :  { %151 = dma.done.wait [#allocation4], 256  }
  0x46   :  { %152 = vsyncadd [#allocation4], 4294967040 }
  0x47   :  { %71 = vsyncpa [#allocation3], 1 }
  0x48   :  { %72 = vsyncpa [#allocation6], 1 }
  0x49   :  { %73 = vsyncpa [#allocation4], 1 }

</bundles_post_ra>
